<compile_context>
chip_gen: v6e
topology: v6e:2x2x1
jax: 0.10.0
libtpu: 0.0.40
codegen_flags: <defaults>
</compile_context>

<pallas_src>
import functools

import jax
import jax.numpy as jnp
from jax.experimental import pallas as pl
from jax.experimental.pallas import tpu as pltpu

QMIN = 0.0              # quint8 range
QMAX = 255.0
NEGATIVE_SLOPE = 0.01   # torch.nn.LeakyReLU() default


def _qleaky_kernel(x_ref, o_ref, *, scale, zero_point, negative_slope):
    """Fused quantize -> (dequant, leaky_relu, requant) -> dequantize.

    Work in the zero-point-shifted integer domain qc = q - zp:
      qc      = clip(round(x * inv_scale), QMIN - zp, QMAX - zp)
      qc >= 0 : requantization is exact          -> out = qc * s
      qc <  0 : out_int = round(slope * qc)      -> out = out_int * s
    The second clip is a provable no-op (|round(slope*qc)| <= zp for
    0 <= slope <= 1), so the whole chain collapses to one round/clip, one
    compare/select, one extra round on the negative branch and a final mul
    (~9 VPU ops/element instead of ~16).

    NOTE: matches PyTorch up to 1-ULP rounding at exact .5 requant boundaries
    (documented tolerance); quint8 values are simulated in f32, never stored.
    """
    x = x_ref[...]
    inv_scale = jnp.float32(1.0 / scale)
    s = jnp.float32(scale)
    slope = jnp.float32(negative_slope)

    # Quantize (round-half-to-even, fbgemm-style multiply by inv_scale),
    # already shifted by the zero point.
    qc = jnp.clip(
        jnp.round(x * inv_scale),
        jnp.float32(QMIN - zero_point),
        jnp.float32(QMAX - zero_point),
    )
    neg = jnp.round(slope * qc)
    o_ref[...] = jnp.where(qc >= 0.0, qc, neg) * s


def quantized_leaky_relu(x, *, scale, zero_point, negative_slope=NEGATIVE_SLOPE):
    """x: float array of any shape (NCHW in the PyTorch test)."""
    orig_shape = x.shape
    total = x.size
    xf = jnp.ravel(x).astype(jnp.float32)

    # --- lane-dense 2-D layout ----------------------------------------------
    # Prefer the widest cols (multiple of 128) that divides `total` while still
    # giving >= 8 rows (full sublane occupancy). Fall back to any divisor, and
    # finally to padding up to a multiple of 128 lanes.
    cols = None
    for c in (2048, 1024, 512, 256, 128):
        if total % c == 0 and total // c >= 8:
            cols = c
            break
    if cols is None:
        for c in (2048, 1024, 512, 256, 128):
            if total % c == 0:
                cols = c
                break
    if cols is None:
        cols = 128

    pad = (-total) % cols
    if pad:
        xf = jnp.pad(xf, (0, pad))
    rows = (total + pad) // cols
    x2d = xf.reshape(rows, cols)

    # --- block sizing --------------------------------------------------------
    # Target ~1 MiB of f32 per block: input + output, each double-buffered,
    # is ~4 MiB of VMEM -- comfortably inside the scoped-VMEM defaults on all
    # of v5e (16 MiB), v6e (32 MiB) and v7x (32 MiB of 64 MiB physical).
    target_block_elems = (1 << 20) // 4            # 256K f32 = 1 MiB
    if rows * cols <= 2 * target_block_elems:
        block_rows = rows                           # tiny input: single block
    else:
        block_rows = max(8, ((target_block_elems // cols) // 8) * 8)
    grid = (pl.cdiv(rows, block_rows),)

    # scale / zero_point are compile-time constants here; distinct values
    # retrace.  Pass them as SMEM scalars instead if they vary at runtime.
    kernel = functools.partial(
        _qleaky_kernel,
        scale=float(scale),
        zero_point=float(zero_point),
        negative_slope=float(negative_slope),
    )

    cost = pl.CostEstimate(
        flops=10 * total,                 # ~10 VPU ops per element
        transcendentals=0,
        bytes_accessed=2 * total * 4,     # read f32 + write f32
    )

    out2d = pl.pallas_call(
        kernel,
        out_shape=jax.ShapeDtypeStruct((rows, cols), jnp.float32),
        grid=grid,
        in_specs=[pl.BlockSpec((block_rows, cols), lambda i: (i, 0))],
        out_specs=pl.BlockSpec((block_rows, cols), lambda i: (i, 0)),
        compiler_params=pltpu.CompilerParams(
            # Independent streaming blocks: shard across the 2 TensorCores on
            # v7x; harmless on single-TC v5e/v6e.
            dimension_semantics=("parallel",),
        ),
        cost_estimate=cost,
    )(x2d)

    out = out2d.reshape(-1)
    if pad:
        out = out[:total]
    return out.reshape(orig_shape)


if __name__ == "__main__":
    # Deterministic example input, NCHW as in the PyTorch test.
    key = jax.random.PRNGKey(0)
    x = jax.random.uniform(
        key, (2, 4, 16, 16), dtype=jnp.float32, minval=-3.0, maxval=3.0
    )

    scale = 0.05
    zero_point = 3  # quint8

    out = quantized_leaky_relu(x, scale=scale, zero_point=zero_point)
    jax.block_until_ready(out)

    # Pure-JAX reference: the literal (unfused) quant -> leaky_relu -> dequant
    # chain of the PyTorch module.
    inv_scale = jnp.float32(1.0 / scale)
    q = jnp.clip(jnp.round(x * inv_scale) + zero_point, QMIN, QMAX)
    deq = (q - zero_point) * scale
    y = jnp.where(deq >= 0.0, deq, NEGATIVE_SLOPE * deq)
    q2 = jnp.clip(jnp.round(y * inv_scale) + zero_point, QMIN, QMAX)
    ref = (q2 - zero_point) * scale

    assert jnp.allclose(out, ref, atol=1e-5), "mismatch vs reference"
    print("KERNEL_OK")
</pallas_src>

<mosaic_0001>
module attributes {stable_mosaic.version = 11 : i64} {
  func.func @_qleaky_kernel(%arg0: i32, %arg1: memref<8x256xf32, #tpu.memory_space<vmem>>, %arg2: memref<8x256xf32, #tpu.memory_space<vmem>>) attributes {dimension_semantics = [#tpu.dimension_semantics<parallel>], iteration_bounds = array<i64: 1>, scalar_prefetch = 0 : i64, scratch_operands = 0 : i64, tpu.core_type = #tpu.core_type<tc>, window_params = [{transform_indices = @transform_0, window_bounds = array<i64: 8, 256>}, {transform_indices = @transform_1, window_bounds = array<i64: 8, 256>}]} {
    %c0 = arith.constant 0 : index
    %c0_0 = arith.constant 0 : index
    %0 = vector.load %arg1[%c0, %c0_0] : memref<8x256xf32, #tpu.memory_space<vmem>>, vector<8x256xf32>
    %cst = arith.constant 2.000000e+01 : f32
    %1 = vector.broadcast %cst : f32 to vector<8x256xf32>
    %2 = arith.mulf %0, %1 : vector<8x256xf32>
    %3 = math.roundeven %2 : vector<8x256xf32>
    %cst_1 = arith.constant -3.000000e+00 : f32
    %cst_2 = arith.constant 2.520000e+02 : f32
    %4 = vector.broadcast %cst_1 : f32 to vector<8x256xf32>
    %5 = arith.maximumf %4, %3 : vector<8x256xf32>
    %6 = vector.broadcast %cst_2 : f32 to vector<8x256xf32>
    %7 = arith.minimumf %6, %5 : vector<8x256xf32>
    %cst_3 = arith.constant 0.00999999977 : f32
    %8 = vector.broadcast %cst_3 : f32 to vector<8x256xf32>
    %9 = arith.mulf %8, %7 : vector<8x256xf32>
    %10 = math.roundeven %9 : vector<8x256xf32>
    %cst_4 = arith.constant 0.000000e+00 : f32
    %11 = vector.broadcast %cst_4 : f32 to vector<8x256xf32>
    %12 = arith.cmpf oge, %7, %11 : vector<8x256xf32>
    %13 = arith.select %12, %7, %10 : vector<8x256xi1>, vector<8x256xf32>
    %cst_5 = arith.constant 5.000000e-02 : f32
    %14 = vector.broadcast %cst_5 : f32 to vector<8x256xf32>
    %15 = arith.mulf %13, %14 : vector<8x256xf32>
    %c0_6 = arith.constant 0 : index
    %c0_7 = arith.constant 0 : index
    %16 = vector.load %arg2[%c0_6, %c0_7] : memref<8x256xf32, #tpu.memory_space<vmem>>, vector<8x256xf32>
    tpu.vector_store %arg2[%c0_6, %c0_7], %15 {strides = array<i32>} : memref<8x256xf32, #tpu.memory_space<vmem>>, vector<8x256xf32>,
    return
  }
  func.func @transform_0(%arg0: i32) -> (i32, i32) {
    %c0_i32 = arith.constant 0 : i32
    %c0_i32_0 = arith.constant 0 : i32
    return %arg0, %c0_i32 : i32, i32
  }
  func.func @transform_1(%arg0: i32) -> (i32, i32) {
    %c0_i32 = arith.constant 0 : i32
    %c0_i32_0 = arith.constant 0 : i32
    return %arg0, %c0_i32 : i32, i32
  }
}

</mosaic_0001>

<bundles_post_ra>
// kernel: tpu_custom_call.1
= control target key start
LH: loop header
LB: loop body
LE: loop exit
PB: predicated region body
PF: predicated region fallthrough
CT: control target
= control target key end

     0   :  { %6 = vsyncpa [#allocation3], 0  ;;  %s154_s0 = inlined_call_operand.hbm [shape: f32[8,256], index: 0, kind: input, shape index: {}]   ;;  %s155_s1 = inlined_call_operand.hbm [shape: f32[8,256], index: 1, kind: output, shape index: {}]  }
   0x1   :  { %7 = vsyncpa [#allocation4], 0  ;;  %s136_s6 = smov [#allocation2]  }
   0x2   :  { %s14_s7 = sshll.u32 %s136_s6, 4  ;;  %s15_s7 = int_to_ptr.vmem [resolvable:$true] %s14_s7 }
   0x3   :  { %s100_s8 = scalar_lea.vmem %s15_s7, 256  ;;  %p105_p1 = scmp.lt.s32.totalorder %s15_s7, %s15_s7 }
   0x4   :  { %p101_p0 = scmp.ne.s32.totalorder %s15_s7, %s100_s8  ;;  %p106_p2 = scmp.lt.s32.totalorder %s100_s8, %s100_s8 }
   0x6   :  { %p107_p3 = por %p106_p2, %p105_p1 }
   0x8   :  { %p108_p4 = pnand %p107_p3, %p101_p0 }
   0xa   :  { %111 = shalt.err (!%p108_p4)
}
   0xb   :  { %17 = dma.hbm_to_vmem [thread:$0]  %s154_s0, 256, %s15_s7, [#allocation3]  }
   0xc   :  { %132 = dma.done.wait [#allocation3], 256  }
   0xd   :  { %133 = vsyncadd [#allocation3], 4294967040  ;;  %v21_v0 = vld [vmem:[#allocation2] sm:$0xff]  ;;  %v22_v1 = vld [vmem:[#allocation2 + $0x8] sm:$0xff]  ;;  %s137_s0 = smov [#allocation5]  }
   0xe   :  { %v23_v2 = vmul.f32 20.0, %v21_v0  ;;  %v24_v3 = vmul.f32 20.0, %v22_v1  ;;  %s49_s11 = sshll.u32 %s137_s0, 4  ;;  %s50_s11 = int_to_ptr.vmem [resolvable:$true] %s49_s11 }
   0xf   :  { %s112_s12 = scalar_lea.vmem %s50_s11, 256  ;;  %p117_p6 = scmp.lt.s32.totalorder %s50_s11, %s50_s11 }
  0x10   :  { %v60_v4 = vcvt.f32.s32 %v23_v2  ;;  %v58_v5 = vand.u32 2147483647, %v23_v2  ;;  %v68_v6 = vcvt.f32.s32 %v24_v3  ;;  %v63_v8 = vand.u32 2147483648, %v23_v2  ;;  %p113_p5 = scmp.ne.s32.totalorder %s50_s11, %s112_s12  ;;  %p118_p7 = scmp.lt.s32.totalorder %s112_s12, %s112_s12 }
  0x11   :  { %v66_v9 = vand.u32 2147483647, %v24_v3  ;;  %v71_v11 = vand.u32 2147483648, %v24_v3 }
  0x12   :  { %v61_v7 = vcvt.s32.f32 %v60_v4  ;;  %v69_v10 = vcvt.s32.f32 %v68_v6  ;;  %vm59_vm0 = vcmp.lt.f32.partialorder %v58_v5, 8388608.0  ;;  %p119_p8 = por %p118_p7, %p117_p6 }
  0x13   :  { %vm67_vm1 = vcmp.lt.f32.partialorder %v66_v9, 8388608.0 }
  0x14   :  { %v62_v12 = vand.u32 2147483647, %v61_v7  ;;  %v70_v13 = vand.u32 2147483647, %v69_v10  ;;  %p120_p9 = pnand %p119_p8, %p113_p5 }
  0x16   :  { %v64_v14 = vor.u32 %v63_v8, %v62_v12  ;;  %v72_v15 = vor.u32 %v71_v11, %v70_v13 }
  0x18   :  { %v65_v16 = vsel %vm59_vm0, %v64_v14, %v23_v2  ;;  %v73_v18 = vsel %vm67_vm1, %v72_v15, %v24_v3 }
  0x19   :  { %v27_v17 = vmax.f32 %v65_v16, -3.0  ;;  %v28_v19 = vmax.f32 %v73_v18, -3.0 }
  0x1b   :  { %v29_v20 = vmin.f32 %v27_v17, 252.0  ;;  %v30_v21 = vmin.f32 %v28_v19, 252.0 }
  0x1d   :  { %v31_v22 = vmul.f32 0.01, %v29_v20  ;;  %v32_v23 = vmul.f32 0.01, %v30_v21  ;;  %vm35_vm3 = vcmp.ge.f32.partialorder %v29_v20, 0.0  ;;  %vm36_vm5 = vcmp.ge.f32.partialorder %v30_v21, 0.0 }
  0x1f   :  { %v76_v24 = vcvt.f32.s32 %v31_v22  ;;  %v74_v25 = vand.u32 2147483647, %v31_v22  ;;  %v84_v26 = vcvt.f32.s32 %v32_v23  ;;  %v79_v28 = vand.u32 2147483648, %v31_v22 }
  0x20   :  { %v82_v29 = vand.u32 2147483647, %v32_v23  ;;  %v87_v31 = vand.u32 2147483648, %v32_v23 }
  0x21   :  { %v77_v27 = vcvt.s32.f32 %v76_v24  ;;  %v85_v30 = vcvt.s32.f32 %v84_v26  ;;  %vm75_vm2 = vcmp.lt.f32.partialorder %v74_v25, 8388608.0 }
  0x22   :  { %vm83_vm4 = vcmp.lt.f32.partialorder %v82_v29, 8388608.0 }
  0x23   :  { %v78_v32 = vand.u32 2147483647, %v77_v27  ;;  %v86_v33 = vand.u32 2147483647, %v85_v30 }
  0x25   :  { %v80_v34 = vor.u32 %v79_v28, %v78_v32  ;;  %v88_v35 = vor.u32 %v87_v31, %v86_v33 }
  0x27   :  { %v81_v36 = vsel %vm75_vm2, %v80_v34, %v31_v22  ;;  %v89_v38 = vsel %vm83_vm4, %v88_v35, %v32_v23 }
  0x28   :  { %v37_v37 = vsel %vm35_vm3, %v29_v20, %v81_v36  ;;  %v38_v40 = vsel %vm36_vm5, %v30_v21, %v89_v38 }
  0x29   :  { %v39_v39 = vmul.f32 0.05, %v37_v37  ;;  %v40_v41 = vmul.f32 0.05, %v38_v40 }
  0x2b   :  { %41 = vst [vmem:[#allocation5] sm:$0xff] %v39_v39  ;;  %42 = vst [vmem:[#allocation5 + $0x8] sm:$0xff] %v40_v41 }
  0x2c   :  { %123 = shalt.err (!%p120_p9)
}
  0x2d   :  { %52 = dma.vmem_to_hbm [thread:$0]  %s50_s11, 256, %s155_s1, [#allocation4]  }
  0x2e   :  { %134 = dma.done.wait [#allocation4], 256  }
  0x2f   :  { %135 = vsyncadd [#allocation4], 4294967040 }
  0x30   :  { %56 = vsyncpa [#allocation3], 1 }
  0x31   :  { %57 = vsyncpa [#allocation4], 1 }

</bundles_post_ra>
